<compile_context>
chip_gen: v5e
topology: v5e:2x2
jax: 0.10.0
libtpu: 0.0.40
codegen_flags: <defaults>
</compile_context>

<pallas_src>
import functools

import jax
import jax.numpy as jnp
from jax.experimental import pallas as pl
from jax.experimental.pallas import tpu as pltpu


def _tap_sum(x, *, axis, k, pad, stride, out_len, full_len, use_roll):
    """Sum of the k replicate-padded, strided pooling taps along `axis`.

    Accumulates in f32 without materializing an f32 copy of the whole input.
    """
    if use_roll:
        # stride == 1 and 2*pad == k-1, so out_len == full_len.
        idx = jax.lax.broadcasted_iota(jnp.int32, x.shape, axis)
        lo = jax.lax.slice_in_dim(x, 0, 1, axis=axis)
        hi = jax.lax.slice_in_dim(x, full_len - 1, full_len, axis=axis)
        acc = x.astype(jnp.float32)                         # d == 0 tap
        for d in range(-pad, pad + 1):
            if d == 0:
                continue
            # rolled[..., j, ...] = x[..., (j + d) % full_len, ...]
            t = pltpu.roll(x, shift=-d, axis=axis)
            if d > 0:
                t = jnp.where(idx >= full_len - d, hi, t)   # clamp to last
            else:
                t = jnp.where(idx < -d, lo, t)               # clamp to first
            acc = acc + t.astype(jnp.float32)
        return acc

    # General path: build the replicate halo by concatenation, then take
    # (possibly strided) shifted slices; cast per-tap into the f32 accumulator.
    # TODO(synk): for stride > 1 restructure to avoid lane-strided slices
    # (e.g. reshape W into (Wo, k) when stride == kernel_size).
    if pad > 0:
        lo = jax.lax.slice_in_dim(x, 0, 1, axis=axis)
        hi = jax.lax.slice_in_dim(x, full_len - 1, full_len, axis=axis)
        x = jnp.concatenate([lo] * pad + [x] + [hi] * pad, axis=axis)
    stop = (out_len - 1) * stride + 1
    acc = jax.lax.slice_in_dim(x, 0, stop, stride=stride,
                               axis=axis).astype(jnp.float32)
    for d in range(1, k):
        acc = acc + jax.lax.slice_in_dim(
            x, d, d + stop, stride=stride, axis=axis).astype(jnp.float32)
    return acc


def _avgpool_kernel(x_ref, o_ref, *, k, stride, pad, Ho, Wo, use_roll):
    """x_ref: (Cb, H, W) unpadded block; o_ref: (Cb, Ho, Wo)."""
    _, H, W = x_ref.shape
    x = x_ref[...]                                            # input dtype
    # Separable pooling: W taps first (lane axis), then H taps (sublane axis).
    wsum = _tap_sum(x, axis=2, k=k, pad=pad, stride=stride,
                    out_len=Wo, full_len=W, use_roll=use_roll)   # (Cb,H,Wo) f32
    acc = _tap_sum(wsum, axis=1, k=k, pad=pad, stride=stride,
                   out_len=Ho, full_len=H, use_roll=use_roll)    # (Cb,Ho,Wo) f32
    o_ref[...] = (acc * (1.0 / (k * k))).astype(o_ref.dtype)


def _vmem_budgets():
    """(tile_budget, vmem_limit) in bytes, generation-aware."""
    try:
        cap = int(pltpu.get_tpu_info().vmem_capacity_bytes)
    except Exception:
        cap = 64 * 1024 * 1024          # conservative: v7x has 64 MiB / core
    tile_budget = min(int(0.6 * cap), 48 * 1024 * 1024)
    vmem_limit = max(32 * 1024 * 1024,
                     min(int(0.85 * cap), 100 * 1024 * 1024))
    return tile_budget, vmem_limit


def _round_up(v, m):
    return -(-v // m) * m


def _pick_channel_block(NC, H, W, Ho, Wo, itemsize, budget):
    """Largest channel block whose full VMEM footprint fits `budget` bytes."""
    # The (8,128) VMEM layout pads the last two dims of every block.
    in_tile = _round_up(H, 8) * _round_up(W, 128)
    out_tile = _round_up(Ho, 8) * _round_up(Wo, 128)
    # Double-buffered I/O tiles at the I/O dtype plus in-kernel f32
    # intermediates (wsum + acc + one shifted/rolled tap + iota/mask).
    per_chan = ((2 * in_tile + 2 * out_tile) * itemsize
                + in_tile * (4 + 4 + itemsize + 5))
    cb = max(1, min(NC, budget // per_chan))
    # Keep at least two grid steps so the DMA pipeline overlaps and v7x's
    # two TensorCores both get work.
    if NC >= 2:
        cb = min(cb, -(-NC // 2))
    # TODO(synk): also tile H (with a replicate halo) when a single channel
    # plane exceeds the budget (cb == 1 and per_chan > budget).
    return int(cb)


def avg_pool2d_pad_rep(x, kernel_size=3, stride=1):
    """Equivalent of AvgPool2d(k, stride)(F.pad(x, (p,p,p,p), mode='replicate'))."""
    k = kernel_size
    pad = k // 2
    N, C, H, W = x.shape
    NC = N * C
    Hp, Wp = H + 2 * pad, W + 2 * pad
    Ho = (Hp - k) // stride + 1
    Wo = (Wp - k) // stride + 1

    # Free, layout-preserving collapse: no transpose, no extra HBM traffic.
    xr = x.reshape(NC, H, W)

    tile_budget, vmem_limit = _vmem_budgets()
    Cb = _pick_channel_block(NC, H, W, Ho, Wo,
                             jnp.dtype(x.dtype).itemsize, tile_budget)
    grid = (pl.cdiv(NC, Cb),)

    # Roll-based halo only for lane/sublane-aligned stride-1 odd-k blocks;
    # everything else uses the concat+slice halo.
    use_roll = (stride == 1 and 2 * pad == k - 1
                and H % 8 == 0 and W % 128 == 0)

    kernel = functools.partial(
        _avgpool_kernel, k=k, stride=stride, pad=pad, Ho=Ho, Wo=Wo,
        use_roll=use_roll)

    out = pl.pallas_call(
        kernel,
        out_shape=jax.ShapeDtypeStruct((NC, Ho, Wo), x.dtype),
        grid_spec=pltpu.PrefetchScalarGridSpec(
            num_scalar_prefetch=0,
            grid=grid,
            in_specs=[pl.BlockSpec((Cb, H, W), lambda c: (c, 0, 0))],
            out_specs=pl.BlockSpec((Cb, Ho, Wo), lambda c: (c, 0, 0)),
        ),
        compiler_params=pltpu.CompilerParams(
            dimension_semantics=("parallel",),
            vmem_limit_bytes=int(vmem_limit),
        ),
    )(xr)

    # Free reshape back to NCHW.
    return out.reshape(N, C, Ho, Wo)


def _reference(x, kernel_size=3, stride=1):
    pad = kernel_size // 2
    xpad = jnp.pad(x, ((0, 0), (0, 0), (pad, pad), (pad, pad)), mode="edge")
    _, _, Hp, Wp = xpad.shape
    Ho = (Hp - kernel_size) // stride + 1
    Wo = (Wp - kernel_size) // stride + 1
    acc = jnp.zeros(x.shape[:2] + (Ho, Wo), jnp.float32)
    for di in range(kernel_size):
        for dj in range(kernel_size):
            acc = acc + xpad[:, :,
                             di:di + stride * Ho:stride,
                             dj:dj + stride * Wo:stride].astype(jnp.float32)
    return (acc / (kernel_size * kernel_size)).astype(x.dtype)


if __name__ == "__main__":
    key = jax.random.PRNGKey(0)
    x = jax.random.normal(key, (2, 4, 16, 16), dtype=jnp.float32)

    y = avg_pool2d_pad_rep(x, kernel_size=3, stride=1)
    y = jax.block_until_ready(y)

    y_ref = _reference(x, kernel_size=3, stride=1)
    assert y.shape == (2, 4, 16, 16), y.shape
    assert jnp.allclose(y, y_ref, atol=1e-5, rtol=1e-5)

    print("KERNEL_OK")
</pallas_src>

<mosaic_0001>
module attributes {stable_mosaic.version = 11 : i64} {
  func.func @_avgpool_kernel(%arg0: i32, %arg1: memref<4x16x16xf32, #tpu.memory_space<vmem>>, %arg2: memref<4x16x16xf32, #tpu.memory_space<vmem>>) attributes {dimension_semantics = [#tpu.dimension_semantics<parallel>], iteration_bounds = array<i64: 2>, scalar_prefetch = 0 : i64, scratch_operands = 0 : i64, tpu.core_type = #tpu.core_type<tc>, window_params = [{transform_indices = @transform_0, window_bounds = array<i64: 4, 16, 16>}, {transform_indices = @transform_1, window_bounds = array<i64: 4, 16, 16>}]} {
    %c0 = arith.constant 0 : index
    %c0_0 = arith.constant 0 : index
    %c0_1 = arith.constant 0 : index
    %0 = vector.load %arg1[%c0, %c0_0, %c0_1] : memref<4x16x16xf32, #tpu.memory_space<vmem>>, vector<4x16x16xf32>
    %1 = vector.extract_strided_slice %0 {offsets = [0, 0, 0], sizes = [4, 16, 1], strides = [1, 1, 1]} : vector<4x16x16xf32> to vector<4x16x1xf32>
    %2 = vector.extract_strided_slice %0 {offsets = [0, 0, 15], sizes = [4, 16, 1], strides = [1, 1, 1]} : vector<4x16x16xf32> to vector<4x16x1xf32>
    %3 = tpu.concatenate %1, %0, %2 in 2 : vector<4x16x1xf32>, vector<4x16x16xf32>, vector<4x16x1xf32> -> vector<4x16x18xf32>
    %4 = vector.extract_strided_slice %3 {offsets = [0, 0, 0], sizes = [4, 16, 16], strides = [1, 1, 1]} : vector<4x16x18xf32> to vector<4x16x16xf32>
    %5 = vector.extract_strided_slice %3 {offsets = [0, 0, 1], sizes = [4, 16, 16], strides = [1, 1, 1]} : vector<4x16x18xf32> to vector<4x16x16xf32>
    %6 = arith.addf %4, %5 : vector<4x16x16xf32>
    %7 = vector.extract_strided_slice %3 {offsets = [0, 0, 2], sizes = [4, 16, 16], strides = [1, 1, 1]} : vector<4x16x18xf32> to vector<4x16x16xf32>
    %8 = arith.addf %6, %7 : vector<4x16x16xf32>
    %9 = vector.extract_strided_slice %8 {offsets = [0, 0, 0], sizes = [4, 1, 16], strides = [1, 1, 1]} : vector<4x16x16xf32> to vector<4x1x16xf32>
    %10 = vector.extract_strided_slice %8 {offsets = [0, 15, 0], sizes = [4, 1, 16], strides = [1, 1, 1]} : vector<4x16x16xf32> to vector<4x1x16xf32>
    %11 = tpu.concatenate %9, %8, %10 in 1 : vector<4x1x16xf32>, vector<4x16x16xf32>, vector<4x1x16xf32> -> vector<4x18x16xf32>
    %12 = vector.extract_strided_slice %11 {offsets = [0, 0, 0], sizes = [4, 16, 16], strides = [1, 1, 1]} : vector<4x18x16xf32> to vector<4x16x16xf32>
    %13 = vector.extract_strided_slice %11 {offsets = [0, 1, 0], sizes = [4, 16, 16], strides = [1, 1, 1]} : vector<4x18x16xf32> to vector<4x16x16xf32>
    %14 = arith.addf %12, %13 : vector<4x16x16xf32>
    %15 = vector.extract_strided_slice %11 {offsets = [0, 2, 0], sizes = [4, 16, 16], strides = [1, 1, 1]} : vector<4x18x16xf32> to vector<4x16x16xf32>
    %16 = arith.addf %14, %15 : vector<4x16x16xf32>
    %cst = arith.constant 0.111111112 : f32
    %17 = vector.broadcast %cst : f32 to vector<4x16x16xf32>
    %18 = arith.mulf %16, %17 : vector<4x16x16xf32>
    %c0_2 = arith.constant 0 : index
    %c0_3 = arith.constant 0 : index
    %c0_4 = arith.constant 0 : index
    %19 = vector.load %arg2[%c0_2, %c0_3, %c0_4] : memref<4x16x16xf32, #tpu.memory_space<vmem>>, vector<4x16x16xf32>
    tpu.vector_store %arg2[%c0_2, %c0_3, %c0_4], %18 {strides = array<i32>} : memref<4x16x16xf32, #tpu.memory_space<vmem>>, vector<4x16x16xf32>,
    return
  }
  func.func @transform_0(%arg0: i32) -> (i32, i32, i32) {
    %c0_i32 = arith.constant 0 : i32
    %c0_i32_0 = arith.constant 0 : i32
    %c0_i32_1 = arith.constant 0 : i32
    return %arg0, %c0_i32, %c0_i32_0 : i32, i32, i32
  }
  func.func @transform_1(%arg0: i32) -> (i32, i32, i32) {
    %c0_i32 = arith.constant 0 : i32
    %c0_i32_0 = arith.constant 0 : i32
    %c0_i32_1 = arith.constant 0 : i32
    return %arg0, %c0_i32, %c0_i32_0 : i32, i32, i32
  }
}

</mosaic_0001>

<bundles_post_ra>
// kernel: tpu_custom_call.1
= control target key start
LH: loop header
LB: loop body
LE: loop exit
PB: predicated region body
PF: predicated region fallthrough
CT: control target
= control target key end

     0   :  { %6 = vsyncpa [#allocation3], 0  ;;  %s946_s0 = inlined_call_operand.hbm [shape: f32[8,16,16], index: 0, kind: input, shape index: {}]   ;;  %s947_s1 = inlined_call_operand.hbm [shape: f32[8,16,16], index: 1, kind: output, shape index: {}]  }
   0x1   :  { %8 = vsyncpa [#allocation3 + $0x1], 0 }
   0x2   :  { %9 = vsyncpa [#allocation4], 0 }
   0x3   :  { %11 = vsyncpa [#allocation4 + $0x1], 0  ;;  %s722_s6 = smov 0   ;;  %s724_s7 = smov 0  }
   0x4   :  { %s726_s8 = smov 0   ;;  %s728_s9 = smov 0  }
   0x5 LB: > { %s743_s10 = sadd.s32 4294967295, %s702_s9   ;;  %s532_s11 = sadd.s32 4294967294, %s702_s9   ;;  %s702_s9 = sphi %s728_s9, %s957_s9   ;;  %s698_s8 = sphi %s726_s8, %s956_s8   ;;  %s694_s7 = sphi %s724_s7, %s955_s7   ;;  %s690_s6 = sphi %s722_s6, %s954_s6  }
   0x6   : > { %s747_s12 = sadd.s32 1, %s702_s9   ;;  %s24_s13 = sadd.s32 1, %s698_s8 }
   0x7   : > { %s21_s14 = ssub.s32 %s702_s9, %s747_s12  ;;  %p31_p0 = scmp.ne.s32.totalorder %s698_s8, %s694_s7 }
   0x8   : > { %p22_p1 = scmp.eq.s32.totalorder %s21_s14, 0  ;;  %p32_p2 = scmp.eq.s32.totalorder %s702_s9, 0 }
   0x9   : > { %p37_p3 = scmp.ne.s32.totalorder %s694_s7, %s690_s6  ;;  %p38_p4 = scmp.eq.s32.totalorder %s743_s10, 0 }
   0xa   : > { %s759_s15 = scalar_select %p22_p1, %s698_s8, %s24_s13  }
   0xb   : > { %p761_p5 = por %p32_p2, %p31_p0  ;;  %p765_p6 = por %p38_p4, %p37_p3 }
   0xc   : > { %p61_p7 = scmp.eq.s32.totalorder %s743_s10, 1  ;;  %p67_p8 = scmp.eq.s32.totalorder %s532_s11, 1 }
   0xd   : > { %p564_p10 = scmp.lt.s32.totalorder %s702_s9, 2  ;;  %s87_s20 = sand.u32 1, %s698_s8  }
   0xe   : > { %p772_p11 = por %p61_p7, %p31_p0  ;;  %p776_p12 = por %p67_p8, %p37_p3 }
   0xf   : > { %s549_s21 = sshll.u32 %s702_s9, 6  ;;  %s535_s22 = sshll.u32 %s87_s20, 6 }
  0x10   : > { %s97_s25 = scalar_lea.hbm %s946_s0, %s549_s21  ;;  %s91_s27 = scalar_lea.vmem [#allocation2], %s535_s22 }
  0x11   : > { %s98_s26 = sshll.u32 %s97_s25, 4  ;;  %s100_s28 = sshll.u32 %s91_s27, 4  ;;  %s99_s26 = int_to_ptr.hbm [resolvable:$true] %s98_s26  ;;  %s101_s28 = int_to_ptr.vmem [resolvable:$true] %s100_s28 }
  0x12   : > { %p787_p13 = pnand %p564_p10, %p761_p5  ;;  %p539_p0 = scmp.ge.s32.totalorder %s702_s9, 1 }
  0x13   : > { %p108_p1 = scmp.lt.s32.totalorder %s702_s9, 3  ;;  %s88_s30 = scalar_lea.sflag [#allocation3], %s87_s20 }
  0x14   : > { %s606_s2 = sshra.s32 %s99_s26, 4  ;;  %p610_p3 = pneg %p787_p13  ;;  %s607_s2 = int_to_ptr.hbm [resolvable:$true] %s606_s2 }
  0x15   : > { %s608_s3 = scalar_lea.hbm %s607_s2, 64  ;;  %s613_s11 = scalar_lea.hbm %s946_s0, 128 }
  0x16   : > { %p609_p2 = scmp.ne.s32.totalorder %s607_s2, %s608_s3  ;;  %p614_p5 = scmp.lt.s32.totalorder %s607_s2, %s946_s0 }
  0x17   : > { %p615_p8 = scmp.lt.s32.totalorder %s613_s11, %s608_s3 }
  0x18   : > { %p611_p4 = pnand %p610_p3, %p609_p2 }
  0x19   : > { %p616_p10 = por %p615_p8, %p614_p5 }
  0x1a   : > { %p612_p7 = pneg %p611_p4 }
  0x1c   : > { %p617_p9 = pnand %p616_p10, %p612_p7 }
  0x1e   : > { %620 = shalt.err (!%p617_p9)
}
  0x1f   : > { %s704_s16 = smov 128   ;;  %s705_s20 = smov 8  }
  0x20   : > { %559 = dma.hbm_to_vmem [thread:$0]  (!%p787_p13), %s99_s26, 1024, %s101_s28, %s88_s30, %s704_s16, %s704_s16, %s705_s20  }
  0x21   : > { %p109_p2 = pnand %p539_p0, %p108_p1 }
  0x22   : > { %s808_s21 = sand.u32 (!%p109_p2), 1, %s694_s7  }
  0x23   : > { %112 = sbr.rel (%p109_p2) target bundleno = 348 (0x15c), region = 24  ;;  %s540_s22 = sshll.u32 (!%p109_p2), %s808_s21, 6 }
  0x24   : > { %s115_s23 = scalar_lea.sflag (!%p109_p2), [#allocation3], %s808_s21  ;;  %s118_s24 = scalar_lea.vmem (!%p109_p2), [#allocation2], %s540_s22 }
  0x28   : > { %681 = dma.done.wait (%p765_p6), %s115_s23, 1024  }
  0x29   : > { %683 = vsyncadd (%p765_p6), %s115_s23, 4294966272  ;;  %v142_v0 = vld [vmem:[%s118_s24 + $0x10] sm:$0xff]  ;;  %v140_v1 = vld [vmem:[%s118_s24] sm:$0xff]  ;;  %s706_s25 = smov 1   ;;  %s707_s26 = smov 2   ;;  %vm204_vm0 = vcmask 7168  }
  0x2a   : > { %160 = vrot.lane.b32.xlu1 %v142_v0, %s706_s25  ;;  %156 = vrot.lane.b32.xlu0 %v140_v1, %s706_s25  ;;  %v144_v2 = vld [vmem:[%s118_s24 + $0x20] sm:$0xff]  ;;  %v143_v3 = vld [vmem:[%s118_s24 + $0x18] sm:$0xff]  ;;  %vm213_vm1 = vcmask 138240   ;;  %s708_s17 = smov 127   ;;  %s709_s27 = smov 126   ;;  %vm302_vm2 = vcmask 1040384  }
  0x2b   : > { %164 = vrot.lane.b32.xlu2 %v144_v2, %s706_s25  ;;  %v141_v4 = vld [vmem:[%s118_s24 + $0x8] sm:$0xff]  ;;  %v147_v6 = vld [vmem:[%s118_s24 + $0x38] sm:$0xff]  ;;  %v146_v7 = vld [vmem:[%s118_s24 + $0x30] sm:$0xff]  ;;  %vm351_vm3 = vcmask 1046528   ;;  %vm388_vm4 = vcmask 1045504   ;;  %vm433_vm5 = vcmask 130048  }
  0x2c   : > { %v145_v5 = vld [vmem:[%s118_s24 + $0x28] sm:$0xff]  ;;  %s877_s28 = scalar_lea.vmem [#allocation5], %s540_s22  ;;  %s551_s29 = sshll.u32 %s743_s10, 6 }
  0x2d   : > { %s455_s3 = scalar_lea.hbm %s947_s1, %s551_s29  ;;  %s456_s10 = sshll.u32 %s877_s28, 4  ;;  %s457_s10 = int_to_ptr.vmem [resolvable:$true] %s456_s10 }
  0x2e   : > { %s458_s4 = sshll.u32 %s455_s3, 4  ;;  %s443_s5 = scalar_lea.sflag [#allocation4], %s808_s21  ;;  %s459_s4 = int_to_ptr.hbm [resolvable:$true] %s458_s4 }
  0x2f   : > { %s650_s11 = sshra.s32 %s459_s4, 4  ;;  %s656_s20 = scalar_lea.hbm %s947_s1, 128  ;;  %s651_s11 = int_to_ptr.hbm [resolvable:$true] %s650_s11 }
  0x30   : > { %s652_s13 = scalar_lea.hbm %s651_s11, 64  ;;  %p657_p0 = scmp.lt.s32.totalorder %s651_s11, %s947_s1 }
  0x31   : > { %p653_p6 = scmp.ne.s32.totalorder %s651_s11, %s652_s13  ;;  %p658_p1 = scmp.lt.s32.totalorder %s656_s20, %s652_s13 }
  0x32   : > { %162 = vrot.lane.b32.xlu1 %v143_v3, %s706_s25  ;;  %158 = vrot.lane.b32.xlu0 %v141_v4, %s706_s25 }
  0x33   : > { %166 = vrot.lane.b32.xlu2 %v145_v5, %s706_s25  ;;  %p654_p9 = pnand %p653_p6, %p772_p11  ;;  %p659_p3 = por %p658_p1, %p657_p0 }
  0x35   : > { %p655_p13 = pneg %p654_p9 }
  0x37   : > { %p660_p4 = pnand %p659_p3, %p655_p13 }
  0x3a   : > { %170 = vrot.lane.b32.xlu1 %v147_v6, %s706_s25  ;;  %168 = vrot.lane.b32.xlu0 %v146_v7, %s706_s25 }
  0x3b   : > { %180 = vrot.lane.b32.xlu2 %v140_v1, %s707_s26 }
  0x42   : > { %184 = vrot.lane.b32.xlu1 %v142_v0, %s707_s26  ;;  %182 = vrot.lane.b32.xlu0 %v141_v4, %s707_s26 }
  0x43   : > { %186 = vrot.lane.b32.xlu2 %v143_v3, %s707_s26 }
  0x4a   : > { %190 = vrot.lane.b32.xlu1 %v145_v5, %s707_s26  ;;  %188 = vrot.lane.b32.xlu0 %v144_v2, %s707_s26 }
  0x4b   : > { %192 = vrot.lane.b32.xlu2 %v146_v7, %s707_s26 }
  0x52   : > { %194 = vrot.lane.b32.xlu0 %v147_v6, %s707_s26 }
  0x85   : > { %v165_v8 = vpop.permute.xlu2 %164 }
  0x86   : > { %v209_v31 = vsel %vm204_vm0, %v144_v2, %v165_v8 }
  0x8d   : > { %v167_v9 = vpop.permute.xlu2 %166 }
  0x8e   : > { %v210_v32 = vsel %vm204_vm0, %v145_v5, %v167_v9 }
  0x95   : > { %v181_v10 = vpop.permute.xlu2 %180 }
  0x9c   : > { %v161_v11 = vpop.permute.xlu1 %160  ;;  %v157_v12 = vpop.permute.xlu0 %156 }
  0x9d   : > { %v205_v13 = vsel %vm204_vm0, %v140_v1, %v157_v12  ;;  %v187_v15 = vpop.permute.xlu2 %186  ;;  %v207_v26 = vsel %vm204_vm0, %v142_v0, %v161_v11 }
  0x9e   : > { %v820_v14 = vsel %vm213_vm1, %v205_v13, %v181_v10 }
  0x9f   : > { %230 = vrot.lane.b32.xlu1 %v820_v14, %s708_s17 }
  0xa4   : > { %v163_v16 = vpop.permute.xlu1 %162  ;;  %v159_v17 = vpop.permute.xlu0 %158 }
  0xa5   : > { %v208_v18 = vsel %vm204_vm0, %v143_v3, %v163_v16  ;;  %v193_v20 = vpop.permute.xlu2 %192  ;;  %v206_v25 = vsel %vm204_vm0, %v141_v4, %v159_v17 }
  0xa6   : > { %v826_v19 = vsel %vm213_vm1, %v208_v18, %v187_v15 }
  0xa7   : > { %236 = vrot.lane.b32.xlu1 %v826_v19, %s708_s17 }
  0xac   : > { %v171_v21 = vpop.permute.xlu1 %170  ;;  %v169_v22 = vpop.permute.xlu0 %168 }
  0xad   : > { %v211_v23 = vsel %vm204_vm0, %v146_v7, %v169_v22  ;;  %v212_v37 = vsel %vm204_vm0, %v147_v6, %v171_v21 }
  0xae   : > { %v832_v24 = vsel %vm213_vm1, %v211_v23, %v193_v20 }
  0xaf   : > { %242 = vrot.lane.b32.xlu1 %v832_v24, %s708_s17 }
  0xb4   : > { %v185_v27 = vpop.permute.xlu1 %184  ;;  %v183_v28 = vpop.permute.xlu0 %182 }
  0xb5   : > { %v216_v29 = vsel %vm213_vm1, %v207_v26, %v185_v27  ;;  %v215_v30 = vsel %vm213_vm1, %v206_v25, %v183_v28 }
  0xb6   : > { %234 = vrot.lane.b32.xlu0 %v216_v29, %s708_s17  ;;  %232 = vrot.lane.b32.xlu2 %v215_v30, %s708_s17 }
  0xb7   : > { %264 = vrot.lane.b32.xlu1 %v215_v30, %s709_s27 }
  0xbc   : > { %v191_v33 = vpop.permute.xlu1 %190  ;;  %v189_v34 = vpop.permute.xlu0 %188 }
  0xbd   : > { %v219_v35 = vsel %vm213_vm1, %v210_v32, %v191_v33  ;;  %v218_v36 = vsel %vm213_vm1, %v209_v31, %v189_v34 }
  0xbe   : > { %240 = vrot.lane.b32.xlu0 %v219_v35, %s708_s17  ;;  %238 = vrot.lane.b32.xlu2 %v218_v36, %s708_s17 }
  0xbf   : > { %270 = vrot.lane.b32.xlu1 %v218_v36, %s709_s27 }
  0xc4   : > { %v195_v38 = vpop.permute.xlu0 %194 }
  0xc5   : > { %v221_v39 = vsel %vm213_vm1, %v212_v37, %v195_v38 }
  0xc6   : > { %262 = vrot.lane.b32.xlu0 %v820_v14, %s709_s27  ;;  %244 = vrot.lane.b32.xlu2 %v221_v39, %s708_s17 }
  0xc7   : > { %276 = vrot.lane.b32.xlu1 %v221_v39, %s709_s27 }
  0xce   : > { %268 = vrot.lane.b32.xlu0 %v826_v19, %s709_s27  ;;  %266 = vrot.lane.b32.xlu2 %v216_v29, %s709_s27 }
  0xd6   : > { %274 = vrot.lane.b32.xlu0 %v832_v24, %s709_s27  ;;  %272 = vrot.lane.b32.xlu2 %v219_v35, %s709_s27 }
 0x110   : > { %v233_v40 = vpop.permute.xlu2 %232 }
 0x111   : > { %v231_v41 = vpop.permute.xlu1 %230  ;;  %v255_v49 = vadd.f32 %v233_v40, %v215_v30 }
 0x112   : > { %v254_v0 = vadd.f32 %v231_v41, %v820_v14 }
 0x118   : > { %v239_v42 = vpop.permute.xlu2 %238 }
 0x119   : > { %v237_v43 = vpop.permute.xlu1 %236  ;;  %v258_v50 = vadd.f32 %v239_v42, %v218_v36 }
 0x120   : > { %v245_v44 = vpop.permute.xlu2 %244 }
 0x121   : > { %v854_v45 = vpop.permute.xlu1 %242  ;;  %v261_v16 = vadd.f32 %v245_v44, %v221_v39 }
 0x128   : > { %v267_v46 = vpop.permute.xlu2 %266  ;;  %v235_v47 = vpop.permute.xlu0 %234 }
 0x129   : > { %v265_v48 = vpop.permute.xlu1 %264  ;;  %v256_v55 = vadd.f32 %v235_v47, %v216_v29 }
 0x12a   : > { %v287_v52 = vadd.f32 %v265_v48, %v255_v49 }
 0x12b   : > { %v857_v1 = vadd.f32 %v267_v46, %v256_v55 }
 0x12c   : > { %v304_v60 = vrot.slane %v287_v52, 7  ;;  %v327_v61 = vrot.slane %v287_v52, 6 }
 0x12d   : > { %v306_v21 = vrot.slane %v857_v1, 7 }
 0x12e   : > { %v339_v12 = vsel %vm302_vm2, %v304_v60, %v327_v61 }
 0x12f   : > { %v355_v22 = vrot.slane %v339_v12, 1  ;;  %v392_v38 = vrot.slane %v339_v12, 2  ;;  %v336_v44 = vsel %vm302_vm2, %v857_v1, %v306_v21 }
 0x130   : > { %v241_v51 = vpop.permute.xlu0 %240  ;;  %v273_v56 = vpop.permute.xlu2 %272  ;;  %v394_v1 = vrot.slane %v336_v44, 2 }
 0x131   : > { %v259_v53 = vadd.f32 %v241_v51, %v219_v35  ;;  %v271_v54 = vpop.permute.xlu1 %270  ;;  %v257_v35 = vadd.f32 %v237_v43, %v826_v19 }
 0x132   : > { %v290_v57 = vadd.f32 %v271_v54, %v258_v50 }
 0x133   : > { %v291_v58 = vadd.f32 %v273_v56, %v259_v53  ;;  %v357_v53 = vrot.slane %v336_v44, 1 }
 0x134   : > { %v309_v59 = vrot.slane %v290_v57, 7 }
 0x135   : > { %v310_v62 = vrot.slane %v291_v58, 7  ;;  %v329_v63 = vrot.slane %v291_v58, 6 }
 0x136   : > { %v337_v2 = vsel %vm302_vm2, %v290_v57, %v309_v59 }
 0x137   : > { %v341_v3 = vsel %vm302_vm2, %v310_v62, %v329_v63  ;;  %v311_v4 = vsel %vm302_vm2, %v309_v59, %v310_v62  ;;  %v362_v5 = vrot.slane %v337_v2, 1  ;;  %v399_v6 = vrot.slane %v337_v2, 2 }
 0x138   : > { %v365_v7 = vrot.slane %v341_v3, 1  ;;  %v402_v8 = vrot.slane %v341_v3, 2  ;;  %v363_v9 = vrot.slane %v311_v4, 1  ;;  %v400_v10 = vrot.slane %v311_v4, 2  ;;  %v263_v11 = vpop.permute.xlu0 %262 }
 0x139   : > { %v286_v13 = vadd.f32 %v263_v11, %v254_v0  ;;  %v277_v30 = vpop.permute.xlu1 %276  ;;  %v260_v0 = vadd.f32 %v854_v45, %v832_v24 }
 0x13a   : > { %v364_v14 = vsel %vm351_vm3, %v362_v5, %v363_v9  ;;  %v366_v15 = vsel %vm351_vm3, %v363_v9, %v365_v7  ;;  %v401_v23 = vsel %vm388_vm4, %v399_v6, %v400_v10  ;;  %v403_v25 = vsel %vm388_vm4, %v400_v10, %v402_v8 }
 0x13b   : > { %v384_v17 = vadd.f32 %v364_v14, %v337_v2  ;;  %v385_v18 = vadd.f32 %v366_v15, %v311_v4  ;;  %v303_v20 = vrot.slane %v286_v13, 7  ;;  %v293_v41 = vadd.f32 %v277_v30, %v261_v16 }
 0x13d   : > { %v421_v26 = vadd.f32 %v401_v23, %v384_v17  ;;  %v422_v27 = vadd.f32 %v403_v25, %v385_v18  ;;  %v305_v28 = vsel %vm302_vm2, %v303_v20, %v304_v60  ;;  %v335_v29 = vsel %vm302_vm2, %v286_v13, %v303_v20 }
 0x13e   : > { %v352_v31 = vrot.slane %v335_v29, 1  ;;  %v353_v32 = vrot.slane %v305_v28, 1  ;;  %v389_v33 = vrot.slane %v335_v29, 2  ;;  %v390_v34 = vrot.slane %v305_v28, 2 }
 0x13f   : > { %v429_v36 = vmul.f32 0.11111111, %v421_v26  ;;  %v430_v37 = vmul.f32 0.11111111, %v422_v27  ;;  %v313_v54 = vrot.slane %v293_v41, 7  ;;  %v330_v55 = vrot.slane %v293_v41, 6 }
 0x140   : > { %v354_v39 = vsel %vm351_vm3, %v352_v31, %v353_v32  ;;  %v356_v40 = vsel %vm351_vm3, %v353_v32, %v355_v22  ;;  %v269_v42 = vpop.permute.xlu0 %268  ;;  %v391_v47 = vsel %vm388_vm4, %v389_v33, %v390_v34  ;;  %v393_v48 = vsel %vm388_vm4, %v390_v34, %v392_v38 }
 0x141   : > { %438 = vst.msk [vmem:[%s877_s28 + $0x20] sm:$0xff] %vm433_vm5, %v429_v36  ;;  %v380_v19 = vadd.f32 %v354_v39, %v335_v29  ;;  %v381_v43 = vadd.f32 %v356_v40, %v305_v28  ;;  %v289_v46 = vadd.f32 %v269_v42, %v257_v35  ;;  %v342_v5 = vsel %vm302_vm2, %v313_v54, %v330_v55 }
 0x142   : > { %439 = vst.msk [vmem:[%s877_s28 + $0x28] sm:$0xff] %vm433_vm5, %v430_v37  ;;  %v370_v12 = vrot.slane %v342_v5, 1  ;;  %v407_v22 = vrot.slane %v342_v5, 2 }
 0x143   : > { %v417_v49 = vadd.f32 %v391_v47, %v380_v19  ;;  %v418_v50 = vadd.f32 %v393_v48, %v381_v43  ;;  %v307_v51 = vrot.slane %v289_v46, 7  ;;  %v328_v52 = vrot.slane %v289_v46, 6 }
 0x145   : > { %v425_v56 = vmul.f32 0.11111111, %v417_v49  ;;  %v426_v57 = vmul.f32 0.11111111, %v418_v50  ;;  %v308_v58 = vsel %vm302_vm2, %v306_v21, %v307_v51  ;;  %v340_v59 = vsel %vm302_vm2, %v307_v51, %v328_v52 }
 0x146   : > { %v358_v60 = vrot.slane %v308_v58, 1  ;;  %v360_v61 = vrot.slane %v340_v59, 1  ;;  %v395_v62 = vrot.slane %v308_v58, 2  ;;  %v397_v63 = vrot.slane %v340_v59, 2 }
 0x147   : > { %434 = vst.msk [vmem:[%s877_s28] sm:$0xff] %vm433_vm5, %v425_v56 }
 0x148   : > { %435 = vst.msk [vmem:[%s877_s28 + $0x8] sm:$0xff] %vm433_vm5, %v426_v57  ;;  %v359_v2 = vsel %vm351_vm3, %v357_v53, %v358_v60  ;;  %v361_v3 = vsel %vm351_vm3, %v358_v60, %v360_v61  ;;  %v275_v4 = vpop.permute.xlu0 %274  ;;  %v396_v9 = vsel %vm388_vm4, %v394_v1, %v395_v62  ;;  %v398_v24 = vsel %vm388_vm4, %v395_v62, %v397_v63 }
 0x149   : > { %v382_v6 = vadd.f32 %v359_v2, %v336_v44  ;;  %v383_v7 = vadd.f32 %v361_v3, %v308_v58  ;;  %v292_v8 = vadd.f32 %v275_v4, %v260_v0 }
 0x14b   : > { %v419_v45 = vadd.f32 %v396_v9, %v382_v6  ;;  %v420_v10 = vadd.f32 %v398_v24, %v383_v7  ;;  %v312_v11 = vrot.slane %v292_v8, 7 }
 0x14d   : > { %v427_v13 = vmul.f32 0.11111111, %v419_v45  ;;  %v428_v14 = vmul.f32 0.11111111, %v420_v10  ;;  %v314_v15 = vsel %vm302_vm2, %v312_v11, %v313_v54  ;;  %v338_v16 = vsel %vm302_vm2, %v292_v8, %v312_v11 }
 0x14e   : > { %v367_v17 = vrot.slane %v338_v16, 1  ;;  %v368_v18 = vrot.slane %v314_v15, 1  ;;  %v404_v20 = vrot.slane %v338_v16, 2  ;;  %v405_v21 = vrot.slane %v314_v15, 2 }
 0x14f   : > { %436 = vst.msk [vmem:[%s877_s28 + $0x10] sm:$0xff] %vm433_vm5, %v427_v13 }
 0x150   : > { %437 = vst.msk [vmem:[%s877_s28 + $0x18] sm:$0xff] %vm433_vm5, %v428_v14  ;;  %v369_v23 = vsel %vm351_vm3, %v367_v17, %v368_v18  ;;  %v371_v25 = vsel %vm351_vm3, %v368_v18, %v370_v12  ;;  %v406_v28 = vsel %vm388_vm4, %v404_v20, %v405_v21  ;;  %v408_v29 = vsel %vm388_vm4, %v405_v21, %v407_v22 }
 0x151   : > { %v386_v26 = vadd.f32 %v369_v23, %v338_v16  ;;  %v387_v27 = vadd.f32 %v371_v25, %v314_v15 }
 0x153   : > { %v423_v30 = vadd.f32 %v406_v28, %v386_v26  ;;  %v424_v31 = vadd.f32 %v408_v29, %v387_v27 }
 0x155   : > { %v431_v32 = vmul.f32 0.11111111, %v423_v30  ;;  %v432_v33 = vmul.f32 0.11111111, %v424_v31 }
 0x157   : > { %440 = vst.msk [vmem:[%s877_s28 + $0x30] sm:$0xff] %vm433_vm5, %v431_v32 }
 0x158   : > { %441 = vst.msk [vmem:[%s877_s28 + $0x38] sm:$0xff] %vm433_vm5, %v432_v33 }
 0x159   : > { %663 = shalt.err (!%p660_p4)
}
 0x15a   : > { %s710_s21 = smov 128   ;;  %s711_s24 = smov 8  }
 0x15b   : > { %554 = dma.vmem_to_hbm [thread:$0]  (%p772_p11), %s457_s10, 1024, %s459_s4, %s443_s5, %s710_s21, %s710_s21, %s711_s24  }
 0x15c PF: > { %s473_s25 = sand.u32 1, %s690_s6   ;;  %p953_p7 = scmp.ge.s32.totalorder %s702_s9, 2 }
 0x15d   : > { %s474_s26 = scalar_lea.sflag [#allocation4], %s473_s25 }
 0x15e   : > { %p561_p5 = pnand %p953_p7, %p776_p12 }
 0x160   : > { %p562_p8 = pneg %p561_p5 }
 0x162   : > { %685 = dma.done.wait (%p562_p8), %s474_s26, 1024  }
 0x163   : > { %687 = vsyncadd (%p562_p8), %s474_s26, 4294966272  ;;  %p14_p10 = scmp.ge.s32.totalorder %s747_s12, 4   ;;  %s954_s6 = smov %s694_s7 }
 0x164   : > { %s955_s7 = smov %s698_s8  ;;  %s956_s8 = smov %s759_s15 }
 0x165   : > { %s957_s9 = smov %s747_s12  ;;  %16 = sbr.rel (!%p14_p10) target bundleno = 5 (0x5), region = 69 }
 0x16a   :  { %480 = vsyncpa [#allocation3], 1 }
 0x16b   :  { %482 = vsyncpa [#allocation3 + $0x1], 1 }
 0x16c   :  { %483 = vsyncpa [#allocation4], 1 }
 0x16d   :  { %485 = vsyncpa [#allocation4 + $0x1], 1 }

</bundles_post_ra>
